<compile_context>
chip_gen: v7x
topology: tpu7x:2x2x1
jax: 0.10.0
libtpu: 0.0.40
codegen_flags: <defaults>
</compile_context>

<pallas_src>
import jax
import jax.numpy as jnp
from jax.experimental import pallas as pl
from jax.experimental.pallas import tpu as pltpu

TM = 128   # encoder row tile
TK = 128   # encoder contraction tile (over nodes)
TB = 128   # decoder pair tile

_PARAMS_2D = pltpu.CompilerParams(
    dimension_semantics=("parallel", "arbitrary"),
    vmem_limit_bytes=32 * 1024 * 1024,
)
_PARAMS_1D = pltpu.CompilerParams(
    dimension_semantics=("parallel",),
    vmem_limit_bytes=32 * 1024 * 1024,
)


def _pad_to(x, multiples):
    pads = []
    for dim, m in zip(x.shape, multiples):
        target = ((dim + m - 1) // m) * m
        pads.append((0, target - dim))
    return jnp.pad(x, pads)


# --------------------- kernel 1: XW = X @ W_enc (row-tiled) -----------------
def xw_kernel(x_ref, w_ref, xw_ref):
    xw_ref[...] = jnp.dot(
        x_ref[...], w_ref[...], preferred_element_type=jnp.float32
    ).astype(xw_ref.dtype)


def compute_xw(x_bf16, w_bf16):
    n, f = x_bf16.shape
    h = w_bf16.shape[1]
    return pl.pallas_call(
        xw_kernel,
        out_shape=jax.ShapeDtypeStruct((n, h), jnp.bfloat16),
        grid=(n // TM,),
        in_specs=[
            pl.BlockSpec((TM, f), lambda i: (i, 0)),
            pl.BlockSpec((f, h), lambda i: (0, 0)),     # W_enc resident
        ],
        out_specs=pl.BlockSpec((TM, h), lambda i: (i, 0)),
        compiler_params=_PARAMS_1D,
    )(x_bf16, w_bf16)


# --------------- kernel 2: h = ReLU(A_norm @ XW + b) (tiled) ----------------
def encoder_kernel(a_ref, xw_ref, b_ref, h_ref, acc_ref):
    @pl.when(pl.program_id(1) == 0)
    def _():
        acc_ref[...] = jnp.zeros_like(acc_ref)

    acc_ref[...] += jnp.dot(
        a_ref[...], xw_ref[...], preferred_element_type=jnp.float32
    )

    @pl.when(pl.program_id(1) == pl.num_programs(1) - 1)
    def _():
        # Bias + ReLU only once per output tile (not per k step).
        h_ref[...] = jnp.maximum(acc_ref[...] + b_ref[...], 0.0).astype(h_ref.dtype)


def gcn_encoder(a_bf16, xw_bf16, b_f32):
    n = a_bf16.shape[0]
    h = xw_bf16.shape[1]
    return pl.pallas_call(
        encoder_kernel,
        out_shape=jax.ShapeDtypeStruct((n, h), jnp.bfloat16),
        grid=(n // TM, n // TK),
        in_specs=[
            pl.BlockSpec((TM, TK), lambda i, k: (i, k)),
            pl.BlockSpec((TK, h), lambda i, k: (k, 0)),
            pl.BlockSpec((1, h), lambda i, k: (0, 0)),
        ],
        out_specs=pl.BlockSpec((TM, h), lambda i, k: (i, 0)),
        scratch_shapes=[pltpu.VMEM((TM, h), jnp.float32)],
        compiler_params=_PARAMS_2D,
    )(a_bf16, xw_bf16, b_f32)


# ----------------------------- decoder kernel -------------------------------
def decoder_kernel(hd_ref, hm_ref, w_ref, out_ref):
    # hdw = h_d @ W_dec   (bf16 operands, f32 accumulation on the MXU)
    hdw = jnp.dot(hd_ref[...], w_ref[...], preferred_element_type=jnp.float32)
    prod = hdw * hm_ref[...].astype(jnp.float32)          # (TB, H) f32 epilogue
    # Lane-dense scores: contract the H axis against a ones row so the result
    # is produced directly as a (1, TB) lane-major row (no masked (TB,1)
    # stores, no in-kernel transpose).
    ones = jnp.ones((1, prod.shape[1]), dtype=jnp.float32)
    s = jax.lax.dot_general(
        ones, prod,
        dimension_numbers=(((1,), (1,)), ((), ())),
        preferred_element_type=jnp.float32,
    )                                                     # (1, TB)
    out_ref[...] = jax.nn.sigmoid(s)


def bilinear_decoder(hd_bf16, hm_bf16, w_dec_bf16):
    bp, h = hd_bf16.shape
    out = pl.pallas_call(
        decoder_kernel,
        out_shape=jax.ShapeDtypeStruct((1, bp), jnp.float32),
        grid=(bp // TB,),
        in_specs=[
            pl.BlockSpec((TB, h), lambda i: (i, 0)),
            pl.BlockSpec((TB, h), lambda i: (i, 0)),
            pl.BlockSpec((h, h), lambda i: (0, 0)),       # W_dec resident
        ],
        out_specs=pl.BlockSpec((1, TB), lambda i: (0, i)),
        compiler_params=_PARAMS_1D,
    )(hd_bf16, hm_bf16, w_dec_bf16)
    return out[0]


# ------------------------------- full model ---------------------------------
def gnnmda_forward(a_norm, x, w_enc, b_enc, w_dec, diseases, mirnas):
    b = diseases.shape[0]

    # Zero-pad all axes to hardware-friendly multiples (zeros cannot leak into
    # any reduction; padded node rows are never gathered).
    a_p = _pad_to(a_norm, (TM, TK))
    x_p = _pad_to(x, (TM, 128))
    w_enc_p = _pad_to(w_enc, (128, 128))
    b_enc_p = _pad_to(b_enc, (1, 128))
    w_dec_p = _pad_to(w_dec, (128, 128))

    # bf16 MXU operands; f32 accumulation happens inside the kernels.
    a_bf = a_p.astype(jnp.bfloat16)
    x_bf = x_p.astype(jnp.bfloat16)
    w_enc_bf = w_enc_p.astype(jnp.bfloat16)
    w_dec_bf = w_dec_p.astype(jnp.bfloat16)

    xw = compute_xw(x_bf, w_enc_bf)            # (Np, Hp) bf16, computed once
    h = gcn_encoder(a_bf, xw, b_enc_p)         # (Np, Hp) bf16

    # Row gather (glue).  Pad the pair list to a multiple of TB; padded pairs
    # reuse index 0 and are sliced away below.
    # TODO(synk): fuse this gather into the decoder via PrefetchScalarGridSpec
    # + pl.Element row-gather BlockSpecs so rows stream straight from h
    # without materializing h_d / h_m in HBM.
    bp = ((b + TB - 1) // TB) * TB
    d_idx = jnp.pad(diseases, (0, bp - b))
    m_idx = jnp.pad(mirnas, (0, bp - b))
    h_d = jnp.take(h, d_idx, axis=0)
    h_m = jnp.take(h, m_idx, axis=0)

    scores = bilinear_decoder(h_d, h_m, w_dec_bf)   # (bp,) f32, lane-dense out
    return scores[:b]


# Pure-JAX reference with the same bf16 matmul-operand casts (f32 accumulate).
def gnnmda_reference(a_norm, x, w_enc, b_enc, w_dec, diseases, mirnas):
    bf = jnp.bfloat16
    xw = jnp.dot(x.astype(bf), w_enc.astype(bf),
                 preferred_element_type=jnp.float32).astype(bf)
    h = jnp.maximum(
        jnp.dot(a_norm.astype(bf), xw, preferred_element_type=jnp.float32)
        + b_enc, 0.0).astype(bf)
    h_d = h[diseases]
    h_m = h[mirnas]
    hdw = jnp.dot(h_d, w_dec.astype(bf), preferred_element_type=jnp.float32)
    s = jnp.sum(hdw * h_m.astype(jnp.float32), axis=-1)
    return jax.nn.sigmoid(s)


if __name__ == "__main__":
    N = 300    # graph nodes (diseases + miRNAs); padded to 384 internally
    F = 128    # input feature dim (lane-aligned per perf review)
    H = 128    # hidden / embedding dim (lane-aligned per perf review)
    B = 200    # number of (disease, mirna) pairs; padded to 256 internally

    key = jax.random.PRNGKey(0)
    k_adj, k_x, k_wenc, k_benc, k_wdec, k_d, k_m = jax.random.split(key, 7)

    # Symmetric adjacency with self-loops, then D^-1/2 A D^-1/2 normalization.
    adj_raw = (jax.random.uniform(k_adj, (N, N)) > 0.95).astype(jnp.float32)
    adj = jnp.maximum(adj_raw, adj_raw.T) + jnp.eye(N, dtype=jnp.float32)
    deg = jnp.sum(adj, axis=1)
    d_inv_sqrt = 1.0 / jnp.sqrt(deg)
    a_norm = adj * d_inv_sqrt[:, None] * d_inv_sqrt[None, :]

    x = jax.random.normal(k_x, (N, F), dtype=jnp.float32)
    w_enc = jax.random.normal(k_wenc, (F, H), dtype=jnp.float32) * 0.2
    b_enc = jax.random.normal(k_benc, (1, H), dtype=jnp.float32) * 0.2
    w_dec = jax.random.normal(k_wdec, (H, H), dtype=jnp.float32) * 0.1

    diseases = jax.random.randint(k_d, (B,), 0, N)
    mirnas = jax.random.randint(k_m, (B,), 0, N)

    out = jax.jit(gnnmda_forward)(a_norm, x, w_enc, b_enc, w_dec,
                                  diseases, mirnas)
    out = jax.block_until_ready(out)

    ref = gnnmda_reference(a_norm, x, w_enc, b_enc, w_dec, diseases, mirnas)
    assert out.shape == (B,), out.shape
    assert jnp.allclose(out, ref, atol=2e-2, rtol=2e-2), (
        float(jnp.max(jnp.abs(out - ref))))

    print("KERNEL_OK")
</pallas_src>

<mosaic_0001>
module attributes {stable_mosaic.version = 11 : i64} {
  func.func @xw_kernel(%arg0: i32, %arg1: memref<128x128xbf16, #tpu.memory_space<vmem>>, %arg2: memref<128x128xbf16, #tpu.memory_space<vmem>>, %arg3: memref<128x128xbf16, #tpu.memory_space<vmem>>) attributes {dimension_semantics = [#tpu.dimension_semantics<parallel>], iteration_bounds = array<i64: 3>, scalar_prefetch = 0 : i64, scratch_operands = 0 : i64, tpu.core_type = #tpu.core_type<tc>, window_params = [{transform_indices = @transform_0, window_bounds = array<i64: 128, 128>}, {pipeline_mode = #tpu.pipeline_mode<synchronous>, transform_indices = @transform_1, window_bounds = array<i64: 128, 128>}, {transform_indices = @transform_2, window_bounds = array<i64: 128, 128>}]} {
    %c0 = arith.constant 0 : index
    %c0_0 = arith.constant 0 : index
    %0 = vector.load %arg1[%c0, %c0_0] : memref<128x128xbf16, #tpu.memory_space<vmem>>, vector<128x128xbf16>
    %c0_1 = arith.constant 0 : index
    %c0_2 = arith.constant 0 : index
    %1 = vector.load %arg2[%c0_1, %c0_2] : memref<128x128xbf16, #tpu.memory_space<vmem>>, vector<128x128xbf16>
    %cst = arith.constant dense<0.000000e+00> : vector<128x128xf32>
    %2 = tpu.matmul %0, %1, %cst {dimension_numbers = #tpu.dot_dimension_numbers<[1], [0], [0], [1], [0, 0, 1, 1], [], []>} : vector<128x128xbf16>, vector<128x128xbf16>, vector<128x128xf32> -> vector<128x128xf32>
    %3 = arith.truncf %2 : vector<128x128xf32> to vector<128x128xbf16>
    %c0_3 = arith.constant 0 : index
    %c0_4 = arith.constant 0 : index
    %4 = vector.load %arg3[%c0_3, %c0_4] : memref<128x128xbf16, #tpu.memory_space<vmem>>, vector<128x128xbf16>
    tpu.vector_store %arg3[%c0_3, %c0_4], %3 {strides = array<i32>} : memref<128x128xbf16, #tpu.memory_space<vmem>>, vector<128x128xbf16>,
    return
  }
  func.func @transform_0(%arg0: i32) -> (i32, i32) {
    %c0_i32 = arith.constant 0 : i32
    %c0_i32_0 = arith.constant 0 : i32
    return %arg0, %c0_i32 : i32, i32
  }
  func.func @transform_1(%arg0: i32) -> (i32, i32) {
    %c0_i32 = arith.constant 0 : i32
    %c0_i32_0 = arith.constant 0 : i32
    %c0_i32_1 = arith.constant 0 : i32
    return %c0_i32, %c0_i32_0 : i32, i32
  }
  func.func @transform_2(%arg0: i32) -> (i32, i32) {
    %c0_i32 = arith.constant 0 : i32
    %c0_i32_0 = arith.constant 0 : i32
    return %arg0, %c0_i32 : i32, i32
  }
}

module attributes {stable_mosaic.version = 11 : i64} {
  func.func @encoder_kernel(%arg0: i32, %arg1: i32, %arg2: memref<128x128xbf16, #tpu.memory_space<vmem>>, %arg3: memref<128x128xbf16, #tpu.memory_space<vmem>>, %arg4: memref<1x128xf32, #tpu.memory_space<vmem>>, %arg5: memref<128x128xbf16, #tpu.memory_space<vmem>>, %arg6: memref<128x128xf32, #tpu.memory_space<vmem>>) attributes {dimension_semantics = [#tpu.dimension_semantics<parallel>, #tpu.dimension_semantics<arbitrary>], iteration_bounds = array<i64: 3, 3>, scalar_prefetch = 0 : i64, scratch_operands = 1 : i64, tpu.core_type = #tpu.core_type<tc>, window_params = [{transform_indices = @transform_0, window_bounds = array<i64: 128, 128>}, {transform_indices = @transform_1, window_bounds = array<i64: 128, 128>}, {pipeline_mode = #tpu.pipeline_mode<synchronous>, transform_indices = @transform_2, window_bounds = array<i64: 1, 128>}, {transform_indices = @transform_3, window_bounds = array<i64: 128, 128>}]} {
    %c0_i32 = arith.constant 0 : i32
    %0 = arith.cmpi eq, %arg1, %c0_i32 : i32
    %1 = arith.extui %0 : i1 to i32
    %c0_i32_0 = arith.constant 0 : i32
    %2 = arith.cmpi ne, %1, %c0_i32_0 : i32
    scf.if %2 {
      %cst_9 = arith.constant 0.000000e+00 : f32
      %12 = vector.broadcast %cst_9 : f32 to vector<128x128xf32>
      %c0_10 = arith.constant 0 : index
      %c0_11 = arith.constant 0 : index
      %13 = vector.load %arg6[%c0_10, %c0_11] : memref<128x128xf32, #tpu.memory_space<vmem>>, vector<128x128xf32>
      tpu.vector_store %arg6[%c0_10, %c0_11], %12 {strides = array<i32>} : memref<128x128xf32, #tpu.memory_space<vmem>>, vector<128x128xf32>,
    } else {
    }
    %c0 = arith.constant 0 : index
    %c0_1 = arith.constant 0 : index
    %3 = vector.load %arg6[%c0, %c0_1] : memref<128x128xf32, #tpu.memory_space<vmem>>, vector<128x128xf32>
    %c0_2 = arith.constant 0 : index
    %c0_3 = arith.constant 0 : index
    %4 = vector.load %arg2[%c0_2, %c0_3] : memref<128x128xbf16, #tpu.memory_space<vmem>>, vector<128x128xbf16>
    %c0_4 = arith.constant 0 : index
    %c0_5 = arith.constant 0 : index
    %5 = vector.load %arg3[%c0_4, %c0_5] : memref<128x128xbf16, #tpu.memory_space<vmem>>, vector<128x128xbf16>
    %cst = arith.constant dense<0.000000e+00> : vector<128x128xf32>
    %6 = tpu.matmul %4, %5, %cst {dimension_numbers = #tpu.dot_dimension_numbers<[1], [0], [0], [1], [0, 0, 1, 1], [], []>} : vector<128x128xbf16>, vector<128x128xbf16>, vector<128x128xf32> -> vector<128x128xf32>
    %7 = arith.addf %3, %6 : vector<128x128xf32>
    %c0_6 = arith.constant 0 : index
    %c0_7 = arith.constant 0 : index
    %8 = vector.load %arg6[%c0_6, %c0_7] : memref<128x128xf32, #tpu.memory_space<vmem>>, vector<128x128xf32>
    tpu.vector_store %arg6[%c0_6, %c0_7], %7 {strides = array<i32>} : memref<128x128xf32, #tpu.memory_space<vmem>>, vector<128x128xf32>,
    %c2_i32 = arith.constant 2 : i32
    %9 = arith.cmpi eq, %arg1, %c2_i32 : i32
    %10 = arith.extui %9 : i1 to i32
    %c0_i32_8 = arith.constant 0 : i32
    %11 = arith.cmpi ne, %10, %c0_i32_8 : i32
    scf.if %11 {
      %c0_9 = arith.constant 0 : index
      %c0_10 = arith.constant 0 : index
      %12 = vector.load %arg6[%c0_9, %c0_10] : memref<128x128xf32, #tpu.memory_space<vmem>>, vector<128x128xf32>
      %c0_11 = arith.constant 0 : index
      %c0_12 = arith.constant 0 : index
      %13 = vector.load %arg4[%c0_11, %c0_12] : memref<1x128xf32, #tpu.memory_space<vmem>>, vector<1x128xf32>
      %14 = vector.broadcast %13 : vector<1x128xf32> to vector<128x128xf32>
      %15 = arith.addf %12, %14 : vector<128x128xf32>
      %cst_13 = arith.constant 0.000000e+00 : f32
      %16 = vector.broadcast %cst_13 : f32 to vector<128x128xf32>
      %17 = arith.maximumf %15, %16 : vector<128x128xf32>
      %18 = arith.truncf %17 : vector<128x128xf32> to vector<128x128xbf16>
      %c0_14 = arith.constant 0 : index
      %c0_15 = arith.constant 0 : index
      %19 = vector.load %arg5[%c0_14, %c0_15] : memref<128x128xbf16, #tpu.memory_space<vmem>>, vector<128x128xbf16>
      tpu.vector_store %arg5[%c0_14, %c0_15], %18 {strides = array<i32>} : memref<128x128xbf16, #tpu.memory_space<vmem>>, vector<128x128xbf16>,
    } else {
    }
    return
  }
  func.func @transform_0(%arg0: i32, %arg1: i32) -> (i32, i32) {
    %c0_i32 = arith.constant 0 : i32
    return %arg0, %arg1 : i32, i32
  }
  func.func @transform_1(%arg0: i32, %arg1: i32) -> (i32, i32) {
    %c0_i32 = arith.constant 0 : i32
    %c0_i32_0 = arith.constant 0 : i32
    return %arg1, %c0_i32 : i32, i32
  }
  func.func @transform_2(%arg0: i32, %arg1: i32) -> (i32, i32) {
    %c0_i32 = arith.constant 0 : i32
    %c0_i32_0 = arith.constant 0 : i32
    %c0_i32_1 = arith.constant 0 : i32
    return %c0_i32, %c0_i32_0 : i32, i32
  }
  func.func @transform_3(%arg0: i32, %arg1: i32) -> (i32, i32) {
    %c0_i32 = arith.constant 0 : i32
    %c0_i32_0 = arith.constant 0 : i32
    return %arg0, %c0_i32 : i32, i32
  }
}

module attributes {stable_mosaic.version = 11 : i64} {
  func.func @decoder_kernel(%arg0: i32, %arg1: memref<128x128xbf16, #tpu.memory_space<vmem>>, %arg2: memref<128x128xbf16, #tpu.memory_space<vmem>>, %arg3: memref<128x128xbf16, #tpu.memory_space<vmem>>, %arg4: memref<1x128xf32, #tpu.memory_space<vmem>>) attributes {dimension_semantics = [#tpu.dimension_semantics<parallel>], iteration_bounds = array<i64: 2>, scalar_prefetch = 0 : i64, scratch_operands = 0 : i64, tpu.core_type = #tpu.core_type<tc>, window_params = [{transform_indices = @transform_0, window_bounds = array<i64: 128, 128>}, {transform_indices = @transform_1, window_bounds = array<i64: 128, 128>}, {pipeline_mode = #tpu.pipeline_mode<synchronous>, transform_indices = @transform_2, window_bounds = array<i64: 128, 128>}, {transform_indices = @transform_3, window_bounds = array<i64: 1, 128>}]} {
    %c0 = arith.constant 0 : index
    %c0_0 = arith.constant 0 : index
    %0 = vector.load %arg1[%c0, %c0_0] : memref<128x128xbf16, #tpu.memory_space<vmem>>, vector<128x128xbf16>
    %c0_1 = arith.constant 0 : index
    %c0_2 = arith.constant 0 : index
    %1 = vector.load %arg3[%c0_1, %c0_2] : memref<128x128xbf16, #tpu.memory_space<vmem>>, vector<128x128xbf16>
    %cst = arith.constant dense<0.000000e+00> : vector<128x128xf32>
    %2 = tpu.matmul %0, %1, %cst {dimension_numbers = #tpu.dot_dimension_numbers<[1], [0], [0], [1], [0, 0, 1, 1], [], []>} : vector<128x128xbf16>, vector<128x128xbf16>, vector<128x128xf32> -> vector<128x128xf32>
    %c0_3 = arith.constant 0 : index
    %c0_4 = arith.constant 0 : index
    %3 = vector.load %arg2[%c0_3, %c0_4] : memref<128x128xbf16, #tpu.memory_space<vmem>>, vector<128x128xbf16>
    %4 = arith.extf %3 : vector<128x128xbf16> to vector<128x128xf32>
    %5 = arith.mulf %2, %4 : vector<128x128xf32>
    %cst_5 = arith.constant 1.000000e+00 : f32
    %6 = vector.broadcast %cst_5 : f32 to vector<1x128xf32>
    %cst_6 = arith.constant dense<0.000000e+00> : vector<1x128xf32>
    %7 = tpu.matmul %6, %5, %cst_6 {dimension_numbers = #tpu.dot_dimension_numbers<[1], [1], [0], [0], [0, 0, 1, 0], [], []>} : vector<1x128xf32>, vector<128x128xf32>, vector<1x128xf32> -> vector<1x128xf32>
    %8 = arith.negf %7 : vector<1x128xf32>
    %9 = math.exp %8 : vector<1x128xf32>
    %cst_7 = arith.constant 1.000000e+00 : f32
    %10 = vector.broadcast %cst_7 : f32 to vector<1x128xf32>
    %11 = arith.addf %10, %9 : vector<1x128xf32>
    %12 = arith.divf %10, %11 : vector<1x128xf32>
    %c0_8 = arith.constant 0 : index
    %c0_9 = arith.constant 0 : index
    %13 = vector.load %arg4[%c0_8, %c0_9] : memref<1x128xf32, #tpu.memory_space<vmem>>, vector<1x128xf32>
    tpu.vector_store %arg4[%c0_8, %c0_9], %12 {strides = array<i32>} : memref<1x128xf32, #tpu.memory_space<vmem>>, vector<1x128xf32>,
    return
  }
  func.func @transform_0(%arg0: i32) -> (i32, i32) {
    %c0_i32 = arith.constant 0 : i32
    %c0_i32_0 = arith.constant 0 : i32
    return %arg0, %c0_i32 : i32, i32
  }
  func.func @transform_1(%arg0: i32) -> (i32, i32) {
    %c0_i32 = arith.constant 0 : i32
    %c0_i32_0 = arith.constant 0 : i32
    return %arg0, %c0_i32 : i32, i32
  }
  func.func @transform_2(%arg0: i32) -> (i32, i32) {
    %c0_i32 = arith.constant 0 : i32
    %c0_i32_0 = arith.constant 0 : i32
    %c0_i32_1 = arith.constant 0 : i32
    return %c0_i32, %c0_i32_0 : i32, i32
  }
  func.func @transform_3(%arg0: i32) -> (i32, i32) {
    %c0_i32 = arith.constant 0 : i32
    %c0_i32_0 = arith.constant 0 : i32
    return %c0_i32, %arg0 : i32, i32
  }
}

</mosaic_0001>

<bundles_post_ra>
// kernel: gnnmda_forward.3
= control target key start
LH: loop header
LB: loop body
LE: loop exit
PB: predicated region body
PF: predicated region fallthrough
CT: control target
= control target key end

     0   :  { %s726_s9 = smov 0   ;;  %s784_s0 = inlined_call_operand.vmem [shape: bf16[384,128], index: 0, kind: input, shape index: {}]   ;;  %s785_s1 = inlined_call_operand.vmem [shape: bf16[128,128], index: 1, kind: input, shape index: {}]   ;;  %s786_s2 = inlined_call_operand.vmem [shape: bf16[384,128], index: 2, kind: output, shape index: {}]  }
   0x1 LB: > { %s509_s10 = sadd.s32 4294967295, %s709_s9   ;;  %p513_p0 = scmp.ge.s32.totalorder %s709_s9, 1  ;;  %s709_s9 = sphi %s726_s9, %s12_s9  }
   0x2   : > { %p113_p1 = scmp.lt.s32.totalorder %s709_s9, 4 }
   0x4   : > { %p114_p2 = pnand %p513_p0, %p113_p1 }
   0x5   : > { %v687_v0 = vld [vmem:[%s785_s1] sm:$0xff] (!%p114_p2)   ;;  %s514_s13 = sshll.u32 (!%p114_p2), %s509_s10, 4  ;;  %v688_v1 = vld [vmem:[%s785_s1 + $0x8] sm:$0xff] (!%p114_p2)   ;;  %v689_v2 = vld [vmem:[%s785_s1 + $0x10] sm:$0xff] (!%p114_p2)  }
   0x6   : > { %117 = sbr.rel (%p114_p2) target bundleno = 264 (0x108), region = 28  ;;  %p136_p3 = scmp.lt.s32.totalorder (!%p114_p2), %s514_s13, 47  ;;  %631 = vmatprep.subr.bf16.mxu0 (!%p114_p2), %v687_v0  ;;  %663 = vmatprep.subr.bf16.mxu1 (!%p114_p2), %v687_v0  ;;  %v690_v3 = vld [vmem:[%s785_s1 + $0x18] sm:$0xff] (!%p114_p2)   ;;  %v691_v6 = vld [vmem:[%s785_s1 + $0x20] sm:$0xff] (!%p114_p2)   ;;  %v692_v7 = vld [vmem:[%s785_s1 + $0x28] sm:$0xff] (!%p114_p2)  }
   0x7   : > { %632 = vmatpush3.bf16.msra.mxu0 (!%p114_p2), %v687_v0  ;;  %671 = vmatpush3.bf16.msra.mxu1 (!%p114_p2), %v687_v0  ;;  %v693_v8 = vld [vmem:[%s785_s1 + $0x30] sm:$0xff] (!%p114_p2)   ;;  %v694_v9 = vld [vmem:[%s785_s1 + $0x38] sm:$0xff] (!%p114_p2)  }
   0x8   : > { %633 = vmatprep.subr.bf16.mxu0 (!%p114_p2), %v688_v1  ;;  %664 = vmatprep.subr.bf16.mxu1 (!%p114_p2), %v688_v1 }
   0xb   : > { %634 = vmatpush3.bf16.msra.mxu0 (!%p114_p2), %v688_v1  ;;  %672 = vmatpush3.bf16.msra.mxu1 (!%p114_p2), %v688_v1 }
   0xc   : > { %635 = vmatprep.subr.bf16.mxu0 (!%p114_p2), %v689_v2  ;;  %665 = vmatprep.subr.bf16.mxu1 (!%p114_p2), %v689_v2 }
   0xd   : > { %s788_s13 = smov (!%p136_p3, %s514_s13), 47 }
   0xe   : > { %s515_s18 = sshll.u32 %s788_s13, 2 }
   0xf   : > { %s751_s21 = scalar_lea.vmem %s784_s0, %s515_s18  ;;  %636 = vmatpush3.bf16.msra.mxu0 %v689_v2  ;;  %673 = vmatpush3.bf16.msra.mxu1 %v689_v2  ;;  %s145_s6 = scalar_lea.vmem %s786_s2, %s515_s18 }
  0x10   : > { %v695_v4 = vld [vmem:[%s751_s21] sm:$0xff]   ;;  %637 = vmatprep.subr.bf16.mxu0 %v690_v3  ;;  %666 = vmatprep.subr.bf16.mxu1 %v690_v3  ;;  %v697_v10 = vld [vmem:[%s751_s21 + $0x8] sm:$0xff]   ;;  %v699_v12 = vld [vmem:[%s751_s21 + $0x10] sm:$0xff]  }
  0x11   : > { %v696_v5 = vld [vmem:[%s751_s21 + $0x20] sm:$0xff]   ;;  %647 = vmatprep.mubr.bf16.mxu0 %v695_v4  ;;  %v698_v11 = vld [vmem:[%s751_s21 + $0x28] sm:$0xff]   ;;  %v700_v13 = vld [vmem:[%s751_s21 + $0x30] sm:$0xff]  }
  0x12   : > { %655 = vmatprep.mubr.bf16.mxu1 %v696_v5  ;;  %v701_v14 = vld [vmem:[%s751_s21 + $0x18] sm:$0xff]  }
  0x13   : > { %638 = vmatpush3.bf16.msra.mxu0 %v690_v3  ;;  %674 = vmatpush3.bf16.msra.mxu1 %v690_v3  ;;  %v702_v15 = vld [vmem:[%s751_s21 + $0x38] sm:$0xff]  }
  0x14   : > { %639 = vmatprep.subr.bf16.mxu0 %v691_v6  ;;  %667 = vmatprep.subr.bf16.mxu1 %v691_v6 }
  0x17   : > { %640 = vmatpush3.bf16.msra.mxu0 %v691_v6  ;;  %675 = vmatpush3.bf16.msra.mxu1 %v691_v6 }
  0x18   : > { %641 = vmatprep.subr.bf16.mxu0 %v692_v7  ;;  %668 = vmatprep.subr.bf16.mxu1 %v692_v7 }
  0x1b   : > { %642 = vmatpush3.bf16.msra.mxu0 %v692_v7  ;;  %676 = vmatpush3.bf16.msra.mxu1 %v692_v7 }
  0x1c   : > { %643 = vmatprep.subr.bf16.mxu0 %v693_v8  ;;  %669 = vmatprep.subr.bf16.mxu1 %v693_v8 }
  0x1f   : > { %644 = vmatpush3.bf16.msra.mxu0 %v693_v8  ;;  %677 = vmatpush3.bf16.msra.mxu1 %v693_v8 }
  0x20   : > { %645 = vmatprep.subr.bf16.mxu0 %v694_v9  ;;  %670 = vmatprep.subr.bf16.mxu1 %v694_v9 }
  0x23   : > { %646 = vmatpush3.bf16.msra.mxu0 %v694_v9  ;;  %678 = vmatpush3.bf16.msra.mxu1 %v694_v9 }
  0x26   : > { %648 = vmatmul.mubr.bf16.vlgmr.msra.gmra.mrb[0].mxu0 %v697_v10  ;;  %656 = vmatmul.mubr.bf16.vlgmr.msra.gmra.mrb[0].mxu1 %v698_v11 }
  0x27   : > { %651 = vmatprep.mubr.bf16.mxu0 %v699_v12  ;;  %659 = vmatprep.mubr.bf16.mxu1 %v700_v13 }
  0x2e   : > { %652 = vmatmul.mubr.bf16.gmra.mrb[4].mxu0 %v701_v14  ;;  %660 = vmatmul.mubr.bf16.gmra.mrb[4].mxu1 %v702_v15 }
  0xf9   : > { %v649_v16 = vpop.f32.mrb[0].mxu0  ;;  %v657_v17 = vpop.f32.mrb[0].mxu1 }
  0xfa   : > { %v310_v18 = vpop.f32.mrb[1].mxu0  ;;  %v342_v19 = vpop.f32.mrb[1].mxu1 }
  0xfb   : > { %v650_v20 = vpop.f32.mrb[2].mxu0  ;;  %v658_v21 = vpop.f32.mrb[2].mxu1 }
  0xfc   : > { %v576_v22 = vpack.c.bf16 %v650_v20, %v649_v16  ;;  %v596_v23 = vpack.c.bf16 %v658_v21, %v657_v17  ;;  %v313_v24 = vpop.f32.mrb[3].mxu0  ;;  %v345_v25 = vpop.f32.mrb[3].mxu1 }
  0xfd   : > { %v571_v26 = vpack.c.bf16 %v313_v24, %v310_v18  ;;  %v591_v27 = vpack.c.bf16 %v345_v25, %v342_v19 }
  0xfe   : > { %608 = vst [vmem:[%s145_s6 + $0x8] sm:$0xff] %v576_v22   ;;  %612 = vst [vmem:[%s145_s6 + $0x28] sm:$0xff] %v596_v23  }
  0xff   : > { %572 = vst [vmem:[%s145_s6] sm:$0xff] %v571_v26   ;;  %611 = vst [vmem:[%s145_s6 + $0x20] sm:$0xff] %v591_v27  }
 0x101   : > { %v653_v28 = vpop.f32.mrb[4].mxu0  ;;  %v661_v29 = vpop.f32.mrb[4].mxu1 }
 0x102   : > { %v326_v30 = vpop.f32.mrb[5].mxu0  ;;  %v358_v31 = vpop.f32.mrb[5].mxu1 }
 0x103   : > { %v654_v32 = vpop.f32.mrb[6].mxu0  ;;  %v662_v33 = vpop.f32.mrb[6].mxu1 }
 0x104   : > { %v586_v34 = vpack.c.bf16 %v654_v32, %v653_v28  ;;  %v606_v35 = vpack.c.bf16 %v662_v33, %v661_v29  ;;  %v329_v36 = vpop.f32.mrb[7].mxu0  ;;  %v361_v37 = vpop.f32.mrb[7].mxu1 }
 0x105   : > { %v581_v38 = vpack.c.bf16 %v329_v36, %v326_v30  ;;  %v601_v39 = vpack.c.bf16 %v361_v37, %v358_v31 }
 0x106   : > { %610 = vst [vmem:[%s145_s6 + $0x18] sm:$0xff] %v586_v34   ;;  %614 = vst [vmem:[%s145_s6 + $0x38] sm:$0xff] %v606_v35  }
 0x107   : > { %609 = vst [vmem:[%s145_s6 + $0x10] sm:$0xff] %v581_v38   ;;  %613 = vst [vmem:[%s145_s6 + $0x30] sm:$0xff] %v601_v39  }
 0x108 PF: > { %s12_s9 = sadd.s32 1, %s709_s9  }
 0x109   : > { %p9_p4 = scmp.ge.s32.totalorder %s12_s9, 5  }
 0x10b   :  { %11 = sbr.rel (!%p9_p4) target bundleno = 1 (0x1), region = 58 }

// kernel: gnnmda_forward.4
= control target key start
LH: loop header
LB: loop body
LE: loop exit
PB: predicated region body
PF: predicated region fallthrough
CT: control target
= control target key end

     0   :  { %s1163_s12 = smov 0   ;;  %s1165_s13 = smov 0   ;;  %s1308_s0 = inlined_call_operand.vmem [shape: bf16[384,384], index: 0, kind: input, shape index: {}]   ;;  %s1309_s1 = inlined_call_operand.vmem [shape: bf16[384,128], index: 1, kind: input, shape index: {}]   ;;  %s1310_s2 = inlined_call_operand.vmem [shape: f32[1,128], index: 2, kind: input, shape index: {}]   ;;  %s1311_s3 = inlined_call_operand.vmem [shape: bf16[384,128], index: 3, kind: output, shape index: {}]  }
   0x1   :  { %s1167_s14 = smov 0   ;;  %s1169_s15 = smov 0  }
   0x2   :  { %s1171_s16 = smov 0   ;;  %s1173_s17 = smov 0  }
   0x3   :  { %s1175_s18 = smov 0  }
   0x4 LB: > { %s22_s19 = sadd.s32 1, %s1132_s16  ;;  %s25_s20 = sadd.s32 1, %s1136_s17  ;;  %s1140_s18 = sphi %s1175_s18, %s13_s18   ;;  %s1136_s17 = sphi %s1173_s17, %s1317_s17   ;;  %s1132_s16 = sphi %s1171_s16, %s1316_s16   ;;  %s1128_s15 = sphi %s1169_s15, %s1315_s15   ;;  %s1124_s14 = sphi %s1167_s14, %s1314_s14   ;;  %s1120_s13 = sphi %s1165_s13, %s1313_s13   ;;  %s1116_s12 = sphi %s1163_s12, %s1312_s12  }
   0x5   : > { %p23_p0 = scmp.ge.s32.totalorder %s22_s19, 3  ;;  %p41_p1 = scmp.ne.s32.totalorder %s1120_s13, %s1116_s12 }
   0x6   : > { %p42_p2 = scmp.eq.s32.totalorder %s1140_s18, 0  ;;  %s34_s24 = sadd.s32 1, %s1120_s13 }
   0x7   : > { %s1319_s19 = smov (%p23_p0, %s22_s19), 0  ;;  %s1321_s20 = smov (!%p23_p0, %s25_s20), %s1136_s17 }
   0x8   : > { %p43_p3 = por %p42_p2, %p41_p1  ;;  %p27_p4 = scmp.ge.s32.totalorder %s1321_s20, 3 }
   0x9   : > { %s30_s21 = ssub.s32 %s1132_s16, %s1319_s19  ;;  %p837_p6 = scmp.ge.s32.totalorder %s1140_s18, 9 }
   0xa   : > { %s1323_s20 = smov (%p27_p4, %s1321_s20), 0 }
   0xb   : > { %s29_s22 = ssub.s32 %s1136_s17, %s1323_s20  ;;  %143 = sbr.rel (%p837_p6) target bundleno = 35 (0x23), region = 20 }
   0xc   : > { %s31_s23 = sor.u32 %s30_s21, %s29_s22 }
   0xd   : > { %p32_p5 = scmp.eq.s32.totalorder %s31_s23, 0 }
   0xf   : > { %s1214_s25 = scalar_select %p32_p5, %s1120_s13, %s34_s24  }
  0x12   : > { %146 = sbr.rel (!%p43_p3) target bundleno = 35 (0x23), region = 24  ;;  %s148_s26 = sand.u32 (%p43_p3), 1, %s1120_s13  }
  0x13   : > { %s1012_s27 = smul.u32 (%p43_p3), 48, %s1136_s17  ;;  %s838_s28 = sshll.u32 (%p43_p3), %s148_s26, 6 }
  0x14   : > { %s150_s7 = scalar_lea.vmem (%p43_p3), [#allocation3], %s838_s28 }
  0x15   : > { %s153_s29 = sadd.s32 (%p43_p3), %s1132_s16, %s1012_s27 }
  0x16   : > { %s841_s30 = sshll.u32 (%p43_p3), %s153_s29, 2 }
  0x17   : > { %s1223_s6 = scalar_lea.vmem (%p43_p3), %s1308_s0, %s841_s30 }
  0x18   : > { %v171_v0 = vld [vmem:[%s1223_s6] sm:$0xf] (%p43_p3)  ;;  %v173_v1 = vld [vmem:[%s1223_s6 + $0xc] sm:$0xf] (%p43_p3)  ;;  %v175_v2 = vld [vmem:[%s1223_s6 + $0x18] sm:$0xf] (%p43_p3) }
  0x19   : > { %172 = vst [vmem:[%s150_s7] sm:$0xf] %v171_v0  ;;  %174 = vst [vmem:[%s150_s7 + $0x4] sm:$0xf] %v173_v1  ;;  %v177_v3 = vld [vmem:[%s1223_s6 + $0x24] sm:$0xf] }
  0x1a   : > { %176 = vst [vmem:[%s150_s7 + $0x8] sm:$0xf] %v175_v2  ;;  %v179_v4 = vld [vmem:[%s1223_s6 + $0x30] sm:$0xf]  ;;  %v181_v5 = vld [vmem:[%s1223_s6 + $0x3c] sm:$0xf] }
  0x1b   : > { %178 = vst [vmem:[%s150_s7 + $0xc] sm:$0xf] %v177_v3  ;;  %180 = vst [vmem:[%s150_s7 + $0x10] sm:$0xf] %v179_v4  ;;  %v183_v6 = vld [vmem:[%s1223_s6 + $0x48] sm:$0xf] }
  0x1c   : > { %182 = vst [vmem:[%s150_s7 + $0x14] sm:$0xf] %v181_v5  ;;  %v185_v7 = vld [vmem:[%s1223_s6 + $0x54] sm:$0xf]  ;;  %v187_v8 = vld [vmem:[%s1223_s6 + $0x60] sm:$0xf] }
  0x1d   : > { %184 = vst [vmem:[%s150_s7 + $0x18] sm:$0xf] %v183_v6  ;;  %186 = vst [vmem:[%s150_s7 + $0x1c] sm:$0xf] %v185_v7  ;;  %v189_v9 = vld [vmem:[%s1223_s6 + $0x6c] sm:$0xf] }
  0x1e   : > { %188 = vst [vmem:[%s150_s7 + $0x20] sm:$0xf] %v187_v8  ;;  %v191_v10 = vld [vmem:[%s1223_s6 + $0x78] sm:$0xf]  ;;  %v193_v11 = vld [vmem:[%s1223_s6 + $0x84] sm:$0xf] }
  0x1f   : > { %190 = vst [vmem:[%s150_s7 + $0x24] sm:$0xf] %v189_v9  ;;  %192 = vst [vmem:[%s150_s7 + $0x28] sm:$0xf] %v191_v10  ;;  %v195_v12 = vld [vmem:[%s1223_s6 + $0x90] sm:$0xf] }
  0x20   : > { %194 = vst [vmem:[%s150_s7 + $0x2c] sm:$0xf] %v193_v11  ;;  %v197_v13 = vld [vmem:[%s1223_s6 + $0x9c] sm:$0xf]  ;;  %v199_v14 = vld [vmem:[%s1223_s6 + $0xa8] sm:$0xf] }
  0x21   : > { %196 = vst [vmem:[%s150_s7 + $0x30] sm:$0xf] %v195_v12  ;;  %198 = vst [vmem:[%s150_s7 + $0x34] sm:$0xf] %v197_v13  ;;  %v201_v15 = vld [vmem:[%s1223_s6 + $0xb4] sm:$0xf] }
  0x22   : > { %200 = vst [vmem:[%s150_s7 + $0x38] sm:$0xf] %v199_v14  ;;  %202 = vst [vmem:[%s150_s7 + $0x3c] sm:$0xf] %v201_v15 }
  0x23 PF: > { %p842_p7 = scmp.ge.s32.totalorder %s1140_s18, 1  ;;  %p265_p8 = scmp.lt.s32.totalorder %s1140_s18, 10 }
  0x25   : > { %p266_p9 = pnand %p842_p7, %p265_p8 }
  0x26   : > { %s272_s8 = sand.u32 (!%p266_p9), 1, %s1116_s12   ;;  %s844_s9 = sshll.u32 (!%p266_p9), %s1124_s14, 4 }
  0x27   : > { %269 = sbr.rel (%p266_p9) target bundleno = 330 (0x14a), region = 69  ;;  %s843_s10 = sshll.u32 (!%p266_p9), %s272_s8, 6 }
  0x28   : > { %p302_p10 = scmp.lt.s32.totalorder (!%p266_p9), %s844_s9, 47  ;;  %s846_s11 = sshll.u32 (!%p266_p9), %s1128_s15, 4 }
  0x29   : > { %p308_p11 = scmp.lt.s32.totalorder (!%p266_p9), %s846_s11, 47  ;;  %s1256_s12 = scalar_lea.vmem (!%p266_p9), [#allocation3], %s843_s10 }
  0x2a   : > { %p848_p12 = scmp.ne.s32.totalorder (!%p266_p9), %s1124_s14, 0 }
  0x2e   : > { %s1325_s9 = smov (!%p302_p10, %s844_s9), 47  ;;  %s1327_s11 = smov (!%p308_p11, %s846_s11), 47 }
  0x2f   : > { %s845_s21 = sshll.u32 %s1325_s9, 2  ;;  %s847_s26 = sshll.u32 %s1327_s11, 2  ;;  %v1142_v16 = vmov (!%p848_p12), 0.0  }
  0x30   : > { %s1249_s24 = scalar_lea.vmem %s1309_s1, %s845_s21  ;;  %s1254_s29 = scalar_lea.vmem %s1311_s3, %s847_s26  ;;  %318 = vst [vmem:[#allocation2] sm:$0xff] (!%p848_p12), %v1142_v16  ;;  %319 = vst [vmem:[#allocation2 + $0x8] sm:$0xff] (!%p848_p12), %v1142_v16 }
  0x31   : > { %317 = sbr.rel (%p848_p12) target bundleno = 56 (0x38), region = 77  ;;  %320 = vst [vmem:[#allocation2 + $0x10] sm:$0xff] (!%p848_p12), %v1142_v16  ;;  %321 = vst [vmem:[#allocation2 + $0x18] sm:$0xff] (!%p848_p12), %v1142_v16 }
  0x32   : > { %322 = vst [vmem:[#allocation2 + $0x20] sm:$0xff] (!%p848_p12), %v1142_v16  ;;  %323 = vst [vmem:[#allocation2 + $0x28] sm:$0xff] (!%p848_p12), %v1142_v16 }
  0x33   : > { %324 = vst [vmem:[#allocation2 + $0x30] sm:$0xff] (!%p848_p12), %v1142_v16  ;;  %325 = vst [vmem:[#allocation2 + $0x38] sm:$0xff] (!%p848_p12), %v1142_v16 }
  0x34   : > { %326 = vst [vmem:[#allocation2 + $0x40] sm:$0xff] (!%p848_p12), %v1142_v16  ;;  %327 = vst [vmem:[#allocation2 + $0x48] sm:$0xff] (!%p848_p12), %v1142_v16 }
  0x35   : > { %328 = vst [vmem:[#allocation2 + $0x50] sm:$0xff] (!%p848_p12), %v1142_v16  ;;  %329 = vst [vmem:[#allocation2 + $0x58] sm:$0xff] (!%p848_p12), %v1142_v16 }
  0x36   : > { %330 = vst [vmem:[#allocation2 + $0x60] sm:$0xff] (!%p848_p12), %v1142_v16  ;;  %331 = vst [vmem:[#allocation2 + $0x68] sm:$0xff] (!%p848_p12), %v1142_v16 }
  0x37   : > { %332 = vst [vmem:[#allocation2 + $0x70] sm:$0xff] (!%p848_p12), %v1142_v16  ;;  %333 = vst [vmem:[#allocation2 + $0x78] sm:$0xff] (!%p848_p12), %v1142_v16 }
  0x38 PF: > { %v1070_v17 = vld [vmem:[%s1249_s24] sm:$0xff]   ;;  %v1071_v18 = vld [vmem:[%s1249_s24 + $0x8] sm:$0xff]   ;;  %v1072_v19 = vld [vmem:[%s1249_s24 + $0x10] sm:$0xff]   ;;  %p865_p13 = scmp.ne.s32.totalorder %s1124_s14, 2 }
  0x39   : > { %964 = vmatprep.subr.bf16.mxu0 %v1070_v17  ;;  %996 = vmatprep.subr.bf16.mxu1 %v1070_v17  ;;  %v1073_v20 = vld [vmem:[%s1249_s24 + $0x18] sm:$0xff]   ;;  %v1078_v21 = vld [vmem:[%s1256_s12] sm:$0xff]   ;;  %v1075_v24 = vld [vmem:[%s1249_s24 + $0x28] sm:$0xff]  }
  0x3a   : > { %965 = vmatpush3.bf16.msra.mxu0 %v1070_v17  ;;  %1004 = vmatpush3.bf16.msra.mxu1 %v1070_v17  ;;  %v1079_v22 = vld [vmem:[%s1256_s12 + $0x20] sm:$0xff]   ;;  %v1076_v25 = vld [vmem:[%s1249_s24 + $0x30] sm:$0xff]   ;;  %v1077_v26 = vld [vmem:[%s1249_s24 + $0x38] sm:$0xff]  }
  0x3b   : > { %966 = vmatprep.subr.bf16.mxu0 %v1071_v18  ;;  %997 = vmatprep.subr.bf16.mxu1 %v1071_v18  ;;  %v1074_v23 = vld [vmem:[%s1249_s24 + $0x20] sm:$0xff]   ;;  %v1080_v27 = vld [vmem:[%s1256_s12 + $0x8] sm:$0xff]   ;;  %v1082_v29 = vld [vmem:[%s1256_s12 + $0x10] sm:$0xff]  }
  0x3c   : > { %980 = vmatprep.mubr.bf16.mxu0 %v1078_v21  ;;  %988 = vmatprep.mubr.bf16.mxu1 %v1079_v22  ;;  %v1081_v28 = vld [vmem:[%s1256_s12 + $0x28] sm:$0xff]   ;;  %v1083_v30 = vld [vmem:[%s1256_s12 + $0x30] sm:$0xff]   ;;  %v1084_v31 = vld [vmem:[%s1256_s12 + $0x18] sm:$0xff]  }
  0x3d   : > { %v1085_v32 = vld [vmem:[%s1256_s12 + $0x38] sm:$0xff]   ;;  %v336_v33 = vld [vmem:[#allocation2 + $0x10] sm:$0xff]  ;;  %v334_v35 = vld [vmem:[#allocation2] sm:$0xff] }
  0x3e   : > { %967 = vmatpush3.bf16.msra.mxu0 %v1071_v18  ;;  %1005 = vmatpush3.bf16.msra.mxu1 %v1071_v18  ;;  %v344_v34 = vld [vmem:[#allocation2 + $0x50] sm:$0xff]  ;;  %v342_v36 = vld [vmem:[#allocation2 + $0x40] sm:$0xff]  ;;  %v337_v39 = vld [vmem:[#allocation2 + $0x18] sm:$0xff] }
  0x3f   : > { %968 = vmatprep.subr.bf16.mxu0 %v1072_v19  ;;  %998 = vmatprep.subr.bf16.mxu1 %v1072_v19  ;;  %v345_v40 = vld [vmem:[#allocation2 + $0x58] sm:$0xff]  ;;  %v335_v45 = vld [vmem:[#allocation2 + $0x8] sm:$0xff]  ;;  %v340_v57 = vld [vmem:[#allocation2 + $0x30] sm:$0xff] }
  0x40   : > { %v343_v46 = vld [vmem:[#allocation2 + $0x48] sm:$0xff]  ;;  %v348_v58 = vld [vmem:[#allocation2 + $0x70] sm:$0xff]  ;;  %v338_v59 = vld [vmem:[#allocation2 + $0x20] sm:$0xff] }
  0x41   : > { %v346_v60 = vld [vmem:[#allocation2 + $0x60] sm:$0xff]  ;;  %v341_v63 = vld [vmem:[#allocation2 + $0x38] sm:$0xff]  ;;  %v339_v5 = vld [vmem:[#allocation2 + $0x28] sm:$0xff] }
  0x42   : > { %969 = vmatpush3.bf16.msra.mxu0 %v1072_v19  ;;  %1006 = vmatpush3.bf16.msra.mxu1 %v1072_v19  ;;  %v349_v0 = vld [vmem:[#allocation2 + $0x78] sm:$0xff]  ;;  %v347_v6 = vld [vmem:[#allocation2 + $0x68] sm:$0xff]  ;;  %v866_v19 = vld [vmem:[%s1310_s2] ss:$0 sm:$0xff] (!%p865_p13) }
  0x43   : > { %970 = vmatprep.subr.bf16.mxu0 %v1073_v20  ;;  %999 = vmatprep.subr.bf16.mxu1 %v1073_v20 }
  0x46   : > { %971 = vmatpush3.bf16.msra.mxu0 %v1073_v20  ;;  %1007 = vmatpush3.bf16.msra.mxu1 %v1073_v20 }
  0x47   : > { %972 = vmatprep.subr.bf16.mxu0 %v1074_v23  ;;  %1000 = vmatprep.subr.bf16.mxu1 %v1074_v23 }
  0x4a   : > { %973 = vmatpush3.bf16.msra.mxu0 %v1074_v23  ;;  %1008 = vmatpush3.bf16.msra.mxu1 %v1074_v23 }
  0x4b   : > { %974 = vmatprep.subr.bf16.mxu0 %v1075_v24  ;;  %1001 = vmatprep.subr.bf16.mxu1 %v1075_v24 }
  0x4e   : > { %975 = vmatpush3.bf16.msra.mxu0 %v1075_v24  ;;  %1009 = vmatpush3.bf16.msra.mxu1 %v1075_v24 }
  0x4f   : > { %976 = vmatprep.subr.bf16.mxu0 %v1076_v25  ;;  %1002 = vmatprep.subr.bf16.mxu1 %v1076_v25 }
  0x52   : > { %977 = vmatpush3.bf16.msra.mxu0 %v1076_v25  ;;  %1010 = vmatpush3.bf16.msra.mxu1 %v1076_v25 }
  0x53   : > { %978 = vmatprep.subr.bf16.mxu0 %v1077_v26  ;;  %1003 = vmatprep.subr.bf16.mxu1 %v1077_v26 }
  0x56   : > { %979 = vmatpush3.bf16.msra.mxu0 %v1077_v26  ;;  %1011 = vmatpush3.bf16.msra.mxu1 %v1077_v26 }
  0x59   : > { %981 = vmatmul.mubr.bf16.vlgmr.msra.gmra.mrb[0].mxu0 %v1080_v27  ;;  %989 = vmatmul.mubr.bf16.vlgmr.msra.gmra.mrb[0].mxu1 %v1081_v28 }
  0x5a   : > { %984 = vmatprep.mubr.bf16.mxu0 %v1082_v29  ;;  %992 = vmatprep.mubr.bf16.mxu1 %v1083_v30 }
  0x61   : > { %985 = vmatmul.mubr.bf16.gmra.mrb[4].mxu0 %v1084_v31  ;;  %993 = vmatmul.mubr.bf16.gmra.mrb[4].mxu1 %v1085_v32 }
 0x12c   : > { %v982_v37 = vpop.f32.mrb[0].mxu0  ;;  %v990_v38 = vpop.f32.mrb[0].mxu1 }
 0x12d   : > { %v577_v41 = vadd.f32 %v982_v37, %v336_v33  ;;  %v585_v42 = vadd.f32 %v990_v38, %v344_v34  ;;  %v512_v43 = vpop.f32.mrb[1].mxu0  ;;  %v544_v44 = vpop.f32.mrb[1].mxu1 }
 0x12e   : > { %v575_v47 = vadd.f32 %v512_v43, %v334_v35  ;;  %v583_v48 = vadd.f32 %v544_v44, %v342_v36  ;;  %v983_v49 = vpop.f32.mrb[2].mxu0  ;;  %v991_v50 = vpop.f32.mrb[2].mxu1 }
 0x12f   : > { %593 = vst [vmem:[#allocation2 + $0x10] sm:$0xff] %v577_v41  ;;  %601 = vst [vmem:[#allocation2 + $0x50] sm:$0xff] %v585_v42  ;;  %v578_v51 = vadd.f32 %v983_v49, %v337_v39  ;;  %v586_v52 = vadd.f32 %v991_v50, %v345_v40  ;;  %v515_v53 = vpop.f32.mrb[3].mxu0  ;;  %v547_v54 = vpop.f32.mrb[3].mxu1 }
 0x130   : > { %591 = vst [vmem:[#allocation2] sm:$0xff] %v575_v47  ;;  %599 = vst [vmem:[#allocation2 + $0x40] sm:$0xff] %v583_v48  ;;  %v576_v55 = vadd.f32 %v515_v53, %v335_v45  ;;  %v584_v56 = vadd.f32 %v547_v54, %v343_v46 }
 0x131   : > { %594 = vst [vmem:[#allocation2 + $0x18] sm:$0xff] %v578_v51  ;;  %602 = vst [vmem:[#allocation2 + $0x58] sm:$0xff] %v586_v52 }
 0x132   : > { %592 = vst [vmem:[#allocation2 + $0x8] sm:$0xff] %v576_v55  ;;  %600 = vst [vmem:[#allocation2 + $0x48] sm:$0xff] %v584_v56 }
 0x134   : > { %v986_v61 = vpop.f32.mrb[4].mxu0  ;;  %v994_v62 = vpop.f32.mrb[4].mxu1  ;;  %610 = sbr.rel (%p865_p13) target bundleno = 330 (0x14a), region = 81 }
 0x135   : > { %v581_v1 = vadd.f32 %v986_v61, %v340_v57  ;;  %v589_v2 = vadd.f32 %v994_v62, %v348_v58  ;;  %v528_v3 = vpop.f32.mrb[5].mxu0  ;;  %v560_v4 = vpop.f32.mrb[5].mxu1 }
 0x136   : > { %v579_v7 = vadd.f32 %v528_v3, %v338_v59  ;;  %v587_v8 = vadd.f32 %v560_v4, %v346_v60  ;;  %v987_v9 = vpop.f32.mrb[6].mxu0  ;;  %v995_v10 = vpop.f32.mrb[6].mxu1  ;;  %v613_v22 = vld [vmem:[#allocation2 + $0x10] sm:$0xff] (!%p865_p13) }
 0x137   : > { %597 = vst [vmem:[#allocation2 + $0x30] sm:$0xff] %v581_v1  ;;  %605 = vst [vmem:[#allocation2 + $0x70] sm:$0xff] %v589_v2  ;;  %v582_v11 = vadd.f32 %v987_v9, %v341_v63  ;;  %v590_v12 = vadd.f32 %v995_v10, %v349_v0  ;;  %v531_v13 = vpop.f32.mrb[7].mxu0  ;;  %v563_v14 = vpop.f32.mrb[7].mxu1  ;;  %v611_v17 = vld [vmem:[#allocation2] sm:$0xff] (!%p865_p13)  ;;  %v636_v25 = vadd.f32 (!%p865_p13), %v866_v19, %v613_v22  ;;  %v621_v37 = vld [vmem:[#allocation2 + $0x50] sm:$0xff] (!%p865_p13) }
 0x138   : > { %595 = vst [vmem:[#allocation2 + $0x20] sm:$0xff] %v579_v7  ;;  %603 = vst [vmem:[#allocation2 + $0x60] sm:$0xff] %v587_v8  ;;  %v580_v15 = vadd.f32 %v531_v13, %v339_v5  ;;  %v588_v16 = vadd.f32 %v563_v14, %v347_v6  ;;  %v634_v20 = vadd.f32 (!%p865_p13), %v866_v19, %v611_v17  ;;  %v614_v23 = vld [vmem:[#allocation2 + $0x18] sm:$0xff] (!%p865_p13)  ;;  %v619_v35 = vld [vmem:[#allocation2 + $0x40] sm:$0xff] (!%p865_p13) }
 0x139   : > { %598 = vst [vmem:[#allocation2 + $0x38] sm:$0xff] %v582_v11  ;;  %606 = vst [vmem:[#allocation2 + $0x78] sm:$0xff] %v590_v12  ;;  %v612_v18 = vld [vmem:[#allocation2 + $0x8] sm:$0xff] (!%p865_p13)  ;;  %v637_v26 = vadd.f32 (!%p865_p13), %v866_v19, %v614_v23  ;;  %v652_v38 = vmax.f32 (!%p865_p13), %v636_v25, 0.0  ;;  %v622_v42 = vld [vmem:[#allocation2 + $0x58] sm:$0xff] (!%p865_p13)  ;;  %v642_v47 = vadd.f32 (!%p865_p13), %v866_v19, %v619_v35  ;;  %v644_v52 = vadd.f32 (!%p865_p13), %v866_v19, %v621_v37 }
 0x13a   : > { %596 = vst [vmem:[#allocation2 + $0x28] sm:$0xff] %v580_v15  ;;  %604 = vst [vmem:[#allocation2 + $0x68] sm:$0xff] %v588_v16  ;;  %v635_v21 = vadd.f32 (!%p865_p13), %v866_v19, %v612_v18  ;;  %v650_v31 = vmax.f32 (!%p865_p13), %v634_v20, 0.0  ;;  %v620_v36 = vld [vmem:[#allocation2 + $0x48] sm:$0xff] (!%p865_p13)  ;;  %v645_v57 = vadd.f32 (!%p865_p13), %v866_v19, %v622_v42 }
 0x13b   : > { %v653_v39 = vmax.f32 %v637_v26, 0.0  ;;  %v643_v51 = vadd.f32 %v866_v19, %v620_v36  ;;  %v658_v56 = vmax.f32 %v642_v47, 0.0  ;;  %v660_v61 = vmax.f32 %v644_v52, 0.0 }
 0x13c   : > { %v651_v32 = vmax.f32 %v635_v21, 0.0  ;;  %v661_v63 = vmax.f32 %v645_v57, 0.0 }
 0x13d   : > { %v909_v49 = vpack.c.bf16 %v653_v39, %v652_v38  ;;  %v659_v60 = vmax.f32 %v643_v51, 0.0 }
 0x13e   : > { %v617_v29 = vld [vmem:[#allocation2 + $0x30] sm:$0xff]  ;;  %v904_v44 = vpack.c.bf16 %v651_v32, %v650_v31  ;;  %v929_v5 = vpack.c.bf16 %v661_v63, %v660_v61 }
 0x13f   : > { %v615_v24 = vld [vmem:[#allocation2 + $0x20] sm:$0xff]  ;;  %v640_v34 = vadd.f32 %v866_v19, %v617_v29  ;;  %v625_v53 = vld [vmem:[#allocation2 + $0x70] sm:$0xff]  ;;  %941 = vst [vmem:[%s1254_s29 + $0x8] sm:$0xff] %v909_v49   ;;  %v924_v3 = vpack.c.bf16 %v659_v60, %v658_v56 }
 0x140   : > { %v638_v28 = vadd.f32 %v866_v19, %v615_v24  ;;  %v618_v30 = vld [vmem:[#allocation2 + $0x38] sm:$0xff]  ;;  %v623_v43 = vld [vmem:[#allocation2 + $0x60] sm:$0xff]  ;;  %905 = vst [vmem:[%s1254_s29] sm:$0xff] %v904_v44   ;;  %v648_v1 = vadd.f32 %v866_v19, %v625_v53  ;;  %945 = vst [vmem:[%s1254_s29 + $0x28] sm:$0xff] %v929_v5  }
 0x141   : > { %v616_v27 = vld [vmem:[#allocation2 + $0x28] sm:$0xff]  ;;  %v641_v41 = vadd.f32 %v866_v19, %v618_v30  ;;  %v656_v46 = vmax.f32 %v640_v34, 0.0  ;;  %v626_v54 = vld [vmem:[#allocation2 + $0x78] sm:$0xff]  ;;  %v646_v58 = vadd.f32 %v866_v19, %v623_v43  ;;  %944 = vst [vmem:[%s1254_s29 + $0x20] sm:$0xff] %v924_v3  }
 0x142   : > { %v639_v33 = vadd.f32 %v866_v19, %v616_v27  ;;  %v654_v40 = vmax.f32 %v638_v28, 0.0  ;;  %v624_v48 = vld [vmem:[#allocation2 + $0x68] sm:$0xff]  ;;  %v649_v2 = vadd.f32 %v866_v19, %v626_v54  ;;  %v664_v6 = vmax.f32 %v648_v1, 0.0 }
 0x143   : > { %v657_v50 = vmax.f32 %v641_v41, 0.0  ;;  %v647_v62 = vadd.f32 %v866_v19, %v624_v48  ;;  %v662_v0 = vmax.f32 %v646_v58, 0.0 }
 0x144   : > { %v655_v45 = vmax.f32 %v639_v33, 0.0  ;;  %v665_v7 = vmax.f32 %v649_v2, 0.0 }
 0x145   : > { %v919_v59 = vpack.c.bf16 %v657_v50, %v656_v46  ;;  %v663_v4 = vmax.f32 %v647_v62, 0.0 }
 0x146   : > { %v914_v55 = vpack.c.bf16 %v655_v45, %v654_v40  ;;  %v939_v9 = vpack.c.bf16 %v665_v7, %v664_v6 }
 0x147   : > { %943 = vst [vmem:[%s1254_s29 + $0x18] sm:$0xff] %v919_v59   ;;  %v934_v8 = vpack.c.bf16 %v663_v4, %v662_v0 }
 0x148   : > { %942 = vst [vmem:[%s1254_s29 + $0x10] sm:$0xff] %v914_v55   ;;  %947 = vst [vmem:[%s1254_s29 + $0x38] sm:$0xff] %v939_v9  }
 0x149   : > { %946 = vst [vmem:[%s1254_s29 + $0x30] sm:$0xff] %v934_v8  }
 0x14a PF: > { %s13_s18 = sadd.s32 1, %s1140_s18   ;;  %s1312_s12 = smov %s1120_s13 }
 0x14b   : > { %p10_p0 = scmp.ge.s32.totalorder %s13_s18, 11   ;;  %s1313_s13 = smov %s1214_s25 }
 0x14c   : > { %s1314_s14 = smov %s1132_s16  ;;  %s1315_s15 = smov %s1136_s17 }
 0x14d   : > { %s1316_s16 = smov %s1319_s19  ;;  %s1317_s17 = smov %s1323_s20 }
 0x14e   :  { %12 = sbr.rel (!%p10_p0) target bundleno = 4 (0x4), region = 119 }

// kernel: gnnmda_forward.5
= control target key start
LH: loop header
LB: loop body
LE: loop exit
PB: predicated region body
PF: predicated region fallthrough
CT: control target
= control target key end

     0   :  { %8 = vsyncpa [#allocation3], 0  ;;  %s1127_s0 = inlined_call_operand.vmem [shape: bf16[256,128], index: 0, kind: input, shape index: {}]   ;;  %s1128_s1 = inlined_call_operand.vmem [shape: bf16[256,128], index: 1, kind: input, shape index: {}]   ;;  %s1129_s2 = inlined_call_operand.vmem [shape: bf16[128,128], index: 2, kind: input, shape index: {}]   ;;  %s1130_s3 = inlined_call_operand.hbm [shape: f32[1,256], index: 3, kind: output, shape index: {}]  }
   0x1   :  { %10 = vsyncpa [#allocation3 + $0x1], 0  ;;  %s966_s12 = smov 0   ;;  %s968_s13 = smov 0  }
   0x2   :  { %s970_s14 = smov 0   ;;  %s972_s15 = smov 0  }
   0x3 LB: > { %s622_s16 = sadd.s32 4294967295, %s939_s15   ;;  %s623_s17 = sadd.s32 4294967294, %s939_s15   ;;  %s939_s15 = sphi %s972_s15, %s1136_s15   ;;  %s935_s14 = sphi %s970_s14, %s1135_s14   ;;  %s931_s13 = sphi %s968_s13, %s1134_s13   ;;  %s927_s12 = sphi %s966_s12, %s1133_s12  }
   0x4   : > { %s989_s18 = sadd.s32 1, %s939_s15   ;;  %s96_s19 = sadd.s32 1, %s935_s14 }
   0x5   : > { %s93_s20 = ssub.s32 %s939_s15, %s989_s18  ;;  %p106_p0 = scmp.ne.s32.totalorder %s935_s14, %s931_s13 }
   0x6   : > { %p94_p1 = scmp.eq.s32.totalorder %s93_s20, 0  ;;  %p107_p2 = scmp.eq.s32.totalorder %s622_s16, 1 }
   0x7   : > { %p112_p3 = scmp.ne.s32.totalorder %s931_s13, %s927_s12  ;;  %p113_p4 = scmp.eq.s32.totalorder %s623_s17, 1 }
   0x8   : > { %s999_s21 = scalar_select %p94_p1, %s935_s14, %s96_s19  }
   0x9   : > { %p1001_p5 = por %p107_p2, %p106_p0  ;;  %p1005_p6 = por %p113_p4, %p112_p3 }
   0xa   : > { %p626_p7 = scmp.ge.s32.totalorder %s939_s15, 1  ;;  %p152_p8 = scmp.lt.s32.totalorder %s939_s15, 3 }
   0xc   : > { %p153_p9 = pnand %p626_p7, %p152_p8 }
   0xd   : > { %v857_v0 = vld [vmem:[%s1129_s2] sm:$0xff] (!%p153_p9)   ;;  %s1014_s26 = sshll.u32 (!%p153_p9), %s622_s16, 4  ;;  %v858_v1 = vld [vmem:[%s1129_s2 + $0x8] sm:$0xff] (!%p153_p9)   ;;  %v859_v2 = vld [vmem:[%s1129_s2 + $0x10] sm:$0xff] (!%p153_p9)   ;;  %v941_v16 = vmov (!%p153_p9), 0.0|0.0   ;;  %vm942_vm0 = vmmov (!%p153_p9), 0  }
   0xe   : > { %156 = sbr.rel (%p153_p9) target bundleno = 580 (0x244), region = 32  ;;  %p181_p10 = scmp.lt.s32.totalorder (!%p153_p9), %s1014_s26, 31  ;;  %723 = vmatprep.subr.bf16.mxu0 (!%p153_p9), %v857_v0  ;;  %v860_v3 = vld [vmem:[%s1129_s2 + $0x18] sm:$0xff] (!%p153_p9)   ;;  %v861_v5 = vld [vmem:[%s1129_s2 + $0x20] sm:$0xff] (!%p153_p9)   ;;  %v862_v6 = vld [vmem:[%s1129_s2 + $0x28] sm:$0xff] (!%p153_p9)   ;;  %790 = vmatprep.subr.bf16.mxu1 (!%p153_p9), %v941_v16  ;;  %v943_v17 = vmov (!%p153_p9), 0.0  }
   0xf   : > { %724 = vmatpush3.bf16.msra.mxu0 (!%p153_p9), %v857_v0  ;;  %v863_v7 = vld [vmem:[%s1129_s2 + $0x30] sm:$0xff] (!%p153_p9)   ;;  %v864_v8 = vld [vmem:[%s1129_s2 + $0x38] sm:$0xff] (!%p153_p9)   ;;  %787 = vmatprep.mubr.msk.f32.mxu1 (!%p153_p9), %vm942_vm0, %v943_v17  ;;  %s1085_s9 = scalar_lea.hbm (!%p153_p9), %s1130_s3, %s1014_s26  ;;  %s945_s16 = smov (!%p153_p9), [#allocation2]  }
  0x10   : > { %725 = vmatprep.subr.bf16.mxu0 (!%p153_p9), %v858_v1  ;;  %s881_s17 = sshll.u32 (!%p153_p9), %s945_s16, 4  ;;  %s882_s17 = int_to_ptr.vmem [resolvable:$false] %s881_s17 }
  0x11   : > { %s883_s19 = scalar_lea.vmem (!%p153_p9), %s882_s17, 32 }
  0x13   : > { %726 = vmatpush3.bf16.msra.mxu0 (!%p153_p9), %v858_v1 }
  0x14   : > { %727 = vmatprep.subr.bf16.mxu0 (!%p153_p9), %v859_v2 }
  0x15   : > { %s1021_s29 = scalar_select %p181_p10, %s1014_s26, 31 }
  0x17   : > { %s628_s5 = sshll.u32 %s1021_s29, 2  ;;  %728 = vmatpush3.bf16.msra.mxu0 %v859_v2  ;;  %s178_s29 = sand.u32 1, %s931_s13  }
  0x18   : > { %s1032_s8 = scalar_lea.vmem %s1127_s0, %s628_s5  ;;  %729 = vmatprep.subr.bf16.mxu0 %v860_v3  ;;  %s1063_s4 = scalar_lea.vmem %s1128_s1, %s628_s5 }
  0x19   : > { %v865_v4 = vld [vmem:[%s1032_s8] sm:$0xff]   ;;  %v866_v9 = vld [vmem:[%s1032_s8 + $0x8] sm:$0xff]   ;;  %v867_v10 = vld [vmem:[%s1032_s8 + $0x10] sm:$0xff]   ;;  %s179_s5 = scalar_lea.vmem [#allocation2], %s178_s29  ;;  %s544_s10 = scalar_lea.sflag [#allocation3], %s178_s29 }
  0x1a   : > { %739 = vmatprep.mubr.bf16.mxu0 %v865_v4  ;;  %v868_v11 = vld [vmem:[%s1032_s8 + $0x18] sm:$0xff]   ;;  %v869_v12 = vld [vmem:[%s1032_s8 + $0x20] sm:$0xff]   ;;  %v870_v13 = vld [vmem:[%s1032_s8 + $0x28] sm:$0xff]   ;;  %s556_s6 = sshll.u32 %s179_s5, 4  ;;  %s1087_s6 = int_to_ptr.vmem [resolvable:$true] %s556_s6 }
  0x1b   : > { %730 = vmatpush3.bf16.msra.mxu0 %v860_v3  ;;  %v871_v14 = vld [vmem:[%s1032_s8 + $0x30] sm:$0xff]   ;;  %v872_v15 = vld [vmem:[%s1032_s8 + $0x38] sm:$0xff]   ;;  %v683_v18 = vld [vmem:[%s1063_s4 + $0x8] sm:$0xff]   ;;  %s877_s11 = scalar_lea.vmem %s1087_s6, 16  ;;  %p884_p0 = scmp.lt.s32.totalorder %s1087_s6, %s882_s17 }
  0x1c   : > { %731 = vmatprep.subr.bf16.mxu0 %v861_v5  ;;  %v652_v19 = vld [vmem:[%s1063_s4] sm:$0xff]   ;;  %v657_v20 = vunpack.c.l.bf16 %v683_v18  ;;  %v658_v22 = vunpack.c.h.bf16 %v683_v18  ;;  %v685_v29 = vld [vmem:[%s1063_s4 + $0x18] sm:$0xff]   ;;  %v684_v32 = vld [vmem:[%s1063_s4 + $0x10] sm:$0xff]   ;;  %p878_p11 = scmp.ne.s32.totalorder %s1087_s6, %s877_s11  ;;  %p885_p1 = scmp.lt.s32.totalorder %s883_s19, %s877_s11 }
  0x1d   : > { %v653_v21 = vunpack.c.l.bf16 %v652_v19  ;;  %v654_v24 = vunpack.c.h.bf16 %v652_v19  ;;  %v665_v35 = vunpack.c.l.bf16 %v685_v29  ;;  %v661_v37 = vunpack.c.l.bf16 %v684_v32  ;;  %v687_v45 = vld [vmem:[%s1063_s4 + $0x28] sm:$0xff]   ;;  %v686_v48 = vld [vmem:[%s1063_s4 + $0x20] sm:$0xff]   ;;  %v689_v61 = vld [vmem:[%s1063_s4 + $0x38] sm:$0xff]  }
  0x1e   : > { %v666_v38 = vunpack.c.h.bf16 %v685_v29  ;;  %v662_v40 = vunpack.c.h.bf16 %v684_v32  ;;  %v673_v51 = vunpack.c.l.bf16 %v687_v45  ;;  %v669_v53 = vunpack.c.l.bf16 %v686_v48  ;;  %v688_v0 = vld [vmem:[%s1063_s4 + $0x30] sm:$0xff]   ;;  %p879_p12 = pnand %p878_p11, %p1001_p5  ;;  %p886_p2 = por %p885_p1, %p884_p0 }
  0x1f   : > { %732 = vmatpush3.bf16.msra.mxu0 %v861_v5  ;;  %v674_v54 = vunpack.c.h.bf16 %v687_v45  ;;  %v670_v56 = vunpack.c.h.bf16 %v686_v48  ;;  %v681_v3 = vunpack.c.l.bf16 %v689_v61  ;;  %v677_v5 = vunpack.c.l.bf16 %v688_v0 }
  0x20   : > { %733 = vmatprep.subr.bf16.mxu0 %v862_v6  ;;  %v944_v19 = vmov 1.0   ;;  %p880_p13 = pneg %p879_p12 }
  0x22   : > { %p887_p3 = pnand %p886_p2, %p880_p13 }
  0x23   : > { %734 = vmatpush3.bf16.msra.mxu0 %v862_v6  ;;  %v682_v6 = vunpack.c.h.bf16 %v689_v61 }
  0x24   : > { %735 = vmatprep.subr.bf16.mxu0 %v863_v7 }
  0x27   : > { %736 = vmatpush3.bf16.msra.mxu0 %v863_v7 }
  0x28   : > { %737 = vmatprep.subr.bf16.mxu0 %v864_v8 }
  0x2b   : > { %738 = vmatpush3.bf16.msra.mxu0 %v864_v8  ;;  %v678_v8 = vunpack.c.h.bf16 %v688_v0 }
  0x2e   : > { %740 = vmatmul.mubr.bf16.vlgmr.msra.gmra.mrb[0].mxu0 %v866_v9 }
  0x2f   : > { %743 = vmatprep.mubr.bf16.mxu0 %v867_v10 }
  0x36   : > { %744 = vmatmul.mubr.bf16.gmra.mrb[4].mxu0 %v868_v11 }
  0x37   : > { %747 = vmatprep.mubr.bf16.mxu0 %v869_v12 }
  0x3e   : > { %748 = vmatmul.mubr.bf16.gmra.mrb[8].mxu0 %v870_v13 }
  0x3f   : > { %751 = vmatprep.mubr.bf16.mxu0 %v871_v14 }
  0x46   : > { %752 = vmatmul.mubr.bf16.gmra.mrb[12].mxu0 %v872_v15 }
 0x101   : > { %v741_v23 = vpop.f32.mrb[0].mxu0 }
 0x102   : > { %v452_v25 = vmul.f32 %v741_v23, %v657_v20  ;;  %v355_v26 = vpop.f32.mrb[1].mxu0 }
 0x103   : > { %v450_v27 = vmul.f32 %v653_v21, %v355_v26  ;;  %v742_v28 = vpop.f32.mrb[2].mxu0 }
 0x104   : > { %v453_v30 = vmul.f32 %v742_v28, %v658_v22  ;;  %v358_v31 = vpop.f32.mrb[3].mxu0 }
 0x105   : > { %v451_v33 = vmul.f32 %v654_v24, %v358_v31 }
 0x106   : > { %v794_v34 = vpack.c.bf16 %v453_v30, %v452_v25 }
 0x107   : > { %v791_v36 = vpack.c.bf16 %v451_v33, %v450_v27 }
 0x109   : > { %792 = vmatpush3.bf16.xpose.msra.mxu1 %v791_v36  ;;  %v745_v39 = vpop.f32.mrb[4].mxu0 }
 0x10a   : > { %v456_v41 = vmul.f32 %v745_v39, %v665_v35  ;;  %v371_v42 = vpop.f32.mrb[5].mxu0  ;;  %793 = vmatprep.subr.bf16.mxu1 %v941_v16 }
 0x10b   : > { %v454_v43 = vmul.f32 %v661_v37, %v371_v42  ;;  %v746_v44 = vpop.f32.mrb[6].mxu0 }
 0x10c   : > { %v457_v46 = vmul.f32 %v746_v44, %v666_v38  ;;  %v374_v47 = vpop.f32.mrb[7].mxu0 }
 0x10d   : > { %v455_v49 = vmul.f32 %v662_v40, %v374_v47 }
 0x10e   : > { %v800_v50 = vpack.c.bf16 %v457_v46, %v456_v41 }
 0x10f   : > { %v797_v52 = vpack.c.bf16 %v455_v49, %v454_v43 }
 0x111   : > { %795 = vmatpush3.bf16.xpose.msra.mxu1 %v794_v34  ;;  %v749_v55 = vpop.f32.mrb[8].mxu0 }
 0x112   : > { %796 = vmatprep.subr.bf16.mxu1 %v941_v16  ;;  %v460_v57 = vmul.f32 %v749_v55, %v673_v51  ;;  %v387_v58 = vpop.f32.mrb[9].mxu0 }
 0x113   : > { %v458_v59 = vmul.f32 %v669_v53, %v387_v58  ;;  %v750_v60 = vpop.f32.mrb[10].mxu0 }
 0x114   : > { %v461_v62 = vmul.f32 %v750_v60, %v674_v54  ;;  %v390_v63 = vpop.f32.mrb[11].mxu0 }
 0x115   : > { %v459_v1 = vmul.f32 %v670_v56, %v390_v63 }
 0x116   : > { %v806_v2 = vpack.c.bf16 %v461_v62, %v460_v57 }
 0x117   : > { %v803_v4 = vpack.c.bf16 %v459_v1, %v458_v59 }
 0x119   : > { %798 = vmatpush3.bf16.xpose.msra.mxu1 %v797_v52  ;;  %v753_v7 = vpop.f32.mrb[12].mxu0 }
 0x11a   : > { %799 = vmatprep.subr.bf16.mxu1 %v941_v16  ;;  %v464_v9 = vmul.f32 %v753_v7, %v681_v3  ;;  %v403_v10 = vpop.f32.mrb[13].mxu0 }
 0x11b   : > { %v462_v11 = vmul.f32 %v677_v5, %v403_v10  ;;  %v754_v12 = vpop.f32.mrb[14].mxu0 }
 0x11c   : > { %v465_v13 = vmul.f32 %v754_v12, %v682_v6  ;;  %v406_v14 = vpop.f32.mrb[15].mxu0 }
 0x11d   : > { %v463_v15 = vmul.f32 %v678_v8, %v406_v14 }
 0x11e   : > { %v812_v17 = vpack.c.bf16 %v465_v13, %v464_v9 }
 0x11f   : > { %v809_v18 = vpack.c.bf16 %v463_v15, %v462_v11 }
 0x121   : > { %801 = vmatpush3.bf16.xpose.msra.mxu1 %v800_v50 }
 0x122   : > { %802 = vmatprep.subr.bf16.mxu1 %v941_v16 }
 0x129   : > { %804 = vmatpush3.bf16.xpose.msra.mxu1 %v803_v4 }
 0x12a   : > { %805 = vmatprep.subr.bf16.mxu1 %v941_v16 }
 0x131   : > { %807 = vmatpush3.bf16.xpose.msra.mxu1 %v806_v2 }
 0x132   : > { %808 = vmatprep.subr.bf16.mxu1 %v941_v16 }
 0x139   : > { %810 = vmatpush3.bf16.xpose.msra.mxu1 %v809_v18 }
 0x13a   : > { %811 = vmatprep.subr.bf16.mxu1 %v941_v16 }
 0x141   : > { %813 = vmatpush3.bf16.xpose.msra.mxu1 %v812_v17 }
 0x148   : > { %788 = vmatmul.mubr.f32.vlgmr.msra.gmra.mrb[0].mxu1 %v944_v19 }
 0x21b   : > { %v532_v20 = vpop.f32.mrb[0].mxu1 }
 0x21c   : > { %v647_v21 = vmul.f32 -1.442695, %v532_v20  ;;  %v789_v22 = vpop.f32.mrb[1].mxu1 }
 0x21e   : > { %873 = vpow2.f32 %v647_v21 }
 0x228   : > { %v874_v23 = vpop.eup %873 }
 0x229   : > { %v539_v24 = vadd.f32 1.0, %v874_v23 }
 0x22b   : > { %875 = vrcp.f32 %v539_v24 }
 0x235   : > { %v876_v16 = vpop.eup %875 }
 0x236   : > { %542 = vst [vmem:[%s179_s5] sm:$0x1] %v876_v16 }
 0x237   : > { %890 = shalt.err (!%p887_p3)
}
 0x238   : > { %s891_s26 = scalar_lea.hbm %s1085_s9, 16  ;;  %s895_s25 = scalar_lea.hbm %s1130_s3, 32 }
 0x239   : > { %p892_p4 = scmp.ne.s32.totalorder %s1085_s9, %s891_s26  ;;  %p896_p9 = scmp.lt.u32.totalorder %s1085_s9, %s1130_s3 }
 0x23a   : > { %p897_p10 = scmp.lt.u32.totalorder %s895_s25, %s891_s26  ;;  %p899_p12 = scmp.lt.u32.totalorder %s891_s26, %s1085_s9 }
 0x23b   : > { %p893_p7 = pnand %p892_p4, %p1001_p5 }
 0x23c   : > { %p898_p11 = por %p897_p10, %p896_p9 }
 0x23d   : > { %p894_p8 = pneg %p893_p7 }
 0x23e   : > { %p900_p13 = por %p899_p12, %p898_p11 }
 0x240   : > { %p901_p0 = pnand %p900_p13, %p894_p8 }
 0x242   : > { %904 = shalt.err (!%p901_p0)
}
 0x243   : > { %814 = dma.vmem_to_hbm [thread:$0]  (%p1001_p5), %s1087_s6, 16, %s1085_s9, %s544_s10  }
 0x244 PF: > { %p820_p1 = scmp.ge.s32.totalorder %s939_s15, 2  ;;  %s568_s30 = sand.u32 1, %s927_s12  }
 0x245   : > { %s569_s4 = scalar_lea.sflag [#allocation3], %s568_s30 }
 0x246   : > { %p817_p2 = pnand %p820_p1, %p1005_p6 }
 0x248   : > { %922 = dma.done.wait (!%p817_p2), %s569_s4, 16  }
 0x249   : > { %924 = vsyncadd (!%p817_p2), %s569_s4, 4294967280  ;;  %p13_p3 = scmp.ge.s32.totalorder %s989_s18, 4   ;;  %s1133_s12 = smov %s931_s13 }
 0x24a   : > { %s1134_s13 = smov %s935_s14  ;;  %s1135_s14 = smov %s999_s21 }
 0x24b   : > { %s1136_s15 = smov %s989_s18  ;;  %15 = sbr.rel (!%p13_p3) target bundleno = 3 (0x3), region = 70 }
 0x252   :  { %573 = vsyncpa [#allocation3], 1 }
 0x253   :  { %575 = vsyncpa [#allocation3 + $0x1], 1 }

</bundles_post_ra>
